<compile_context>
chip_gen: v7x
topology: tpu7x:2x2x1
jax: 0.10.0
libtpu: 0.0.40
codegen_flags: <defaults>
</compile_context>

<pallas_src>
import functools

import jax
import jax.numpy as jnp
from jax.experimental import pallas as pl
from jax.experimental.pallas import tpu as pltpu


def _uce_kernel(x_ref, lab_ref, sum_ref, cnt_ref, acc_s_ref, acc_c_ref, *,
                old_cl, ignore_index, n_pix):
    """Per (image, pixel-block) step: column-wise (per-pixel) LSE + NLL pick."""
    p = pl.program_id(1)

    @pl.when(p == 0)
    def _():
        acc_s_ref[...] = jnp.zeros_like(acc_s_ref)
        acc_c_ref[...] = jnp.zeros_like(acc_c_ref)

    x = x_ref[0].astype(jnp.float32)          # (C, TILE_P)  classes x pixels
    lab = lab_ref[0]                          # (1, TILE_P)  int32
    c, tile_p = x.shape

    row = jax.lax.broadcasted_iota(jnp.int32, (c, tile_p), 0)

    # single shared-max pass: one max, one exp, two masked sublane sums
    m = jnp.max(x, axis=0, keepdims=True)                       # (1, TILE_P)
    e = jnp.exp(x - m)                                          # (C, TILE_P)
    den = m + jnp.log(jnp.sum(e, axis=0, keepdims=True))        # (1, TILE_P)
    s_old = jnp.sum(jnp.where(row < old_cl, e, 0.0), axis=0, keepdims=True)
    # clamp: if every old-class logit underflows vs. the global max, s_old == 0
    old_lse = m + jnp.log(jnp.maximum(s_old, jnp.finfo(jnp.float32).tiny))

    # gather x[label, pixel] via a sublane one-hot select (C is small)
    picked = jnp.sum(jnp.where(row == lab, x, 0.0), axis=0, keepdims=True)

    # targets < old_cl collapse to background (class 0) -> old-class LSE
    out_val = jnp.where(lab < old_cl, old_lse, picked) - den     # (1, TILE_P)

    # valid = not ignore_index and inside the real pixel range (ragged tail)
    pix = p * tile_p + jax.lax.broadcasted_iota(jnp.int32, (1, tile_p), 1)
    valid = (lab != ignore_index) & (pix < n_pix)

    acc_s_ref[...] += jnp.where(valid, -out_val, 0.0)
    acc_c_ref[...] += valid.astype(jnp.float32)

    @pl.when(p == pl.num_programs(1) - 1)
    def _():
        sum_ref[...] = jnp.sum(acc_s_ref[...]).reshape(1, 1, 1)
        cnt_ref[...] = jnp.sum(acc_c_ref[...]).reshape(1, 1, 1)


def _vmem_capacity_bytes():
    """Per-generation VMEM capacity (v5e/v6e: 128 MiB, v7x: 64 MiB)."""
    try:
        info = pltpu.get_tpu_info()
        cap = getattr(info, "vmem_capacity_bytes", None)
        if cap:
            return int(cap)
    except Exception:
        pass
    return 64 * 1024 * 1024     # conservative (v7x-sized) fallback


def unbiased_cross_entropy(inputs, targets, *, old_cl, mask=None,
                           ignore_index=255, reduction="mean",
                           block_pixels=None):
    """inputs: (N, C, H, W) float (f32 or bf16); targets: (N, H, W) int.

    Returns the scalar unbiased CE loss (reduction='mean' or 'sum')."""
    assert inputs.ndim == 4 and targets.ndim == 3
    N, C, H, W = inputs.shape
    assert 0 < old_cl <= C
    HW = H * W

    # Wrapper glue is pure reshapes (no transpose, no pad -> no HBM copies).
    x = inputs.reshape(N, C, HW)                       # classes on sublanes
    lab = targets.reshape(N, 1, HW).astype(jnp.int32)  # pixels lane-dense
    if mask is not None:
        lab = jnp.where(mask.reshape(N, 1, HW), jnp.int32(ignore_index), lab)

    vmem_cap = _vmem_capacity_bytes()
    vmem_limit = int(min(vmem_cap * 3 // 4, 100 * 1024 * 1024))

    if block_pixels is None:
        # ~vmem_limit/12 bytes per logits buffer leaves room for the two
        # pipeline copies plus a handful of (C, TILE_P) f32 intermediates.
        x_buf_budget = max(512 * 1024, vmem_limit // 12)
        bytes_per_col = C * jnp.dtype(inputs.dtype).itemsize
        block_pixels = (x_buf_budget // bytes_per_col) // 128 * 128
        block_pixels = int(max(128, min(block_pixels, 64 * 1024)))

    if HW <= block_pixels:
        tile_p = HW                              # single block = full dim (ok)
    else:
        tile_p = max(128, (block_pixels // 128) * 128)   # lane-aligned tile
    n_blocks = pl.cdiv(HW, tile_p)

    kernel = functools.partial(_uce_kernel, old_cl=old_cl,
                               ignore_index=ignore_index, n_pix=HW)

    sums, cnts = pl.pallas_call(
        kernel,
        out_shape=(jax.ShapeDtypeStruct((N, 1, 1), jnp.float32),
                   jax.ShapeDtypeStruct((N, 1, 1), jnp.float32)),
        grid_spec=pltpu.PrefetchScalarGridSpec(
            num_scalar_prefetch=0,
            grid=(N, n_blocks),
            in_specs=[
                pl.BlockSpec((1, C, tile_p), lambda n, p: (n, 0, p)),
                pl.BlockSpec((1, 1, tile_p), lambda n, p: (n, 0, p)),
            ],
            out_specs=[
                pl.BlockSpec((1, 1, 1), lambda n, p: (n, 0, 0)),
                pl.BlockSpec((1, 1, 1), lambda n, p: (n, 0, 0)),
            ],
            scratch_shapes=[
                pltpu.VMEM((1, tile_p), jnp.float32),   # loss partial sums
                pltpu.VMEM((1, tile_p), jnp.float32),   # valid-pixel counts
            ],
        ),
        compiler_params=pltpu.CompilerParams(
            dimension_semantics=("parallel", "arbitrary"),
            vmem_limit_bytes=vmem_limit),
    )(x, lab)

    total = jnp.sum(sums)
    count = jnp.sum(cnts)
    if reduction == "mean":
        return total / count          # NaN if no valid pixels, same as torch
    elif reduction == "sum":
        return total
    else:
        raise NotImplementedError("only 'mean' and 'sum' reductions supported")
        # TODO(synk): reduction='none' (per-pixel loss map) not implemented.


def _reference(inputs, targets, *, old_cl, ignore_index=255):
    """Pure-JAX reference mirroring the PyTorch module (reduction='mean')."""
    den = jax.scipy.special.logsumexp(inputs, axis=1)                  # (N,H,W)
    old_lse = jax.scipy.special.logsumexp(inputs[:, :old_cl], axis=1)  # (N,H,W)
    labels = jnp.where(targets < old_cl, 0, targets)
    picked = jnp.take_along_axis(inputs, labels[:, None].astype(jnp.int32),
                                 axis=1)[:, 0]
    out_at_label = jnp.where(labels == 0, old_lse - den, picked - den)
    valid = targets != ignore_index
    return -jnp.sum(jnp.where(valid, out_at_label, 0.0)) / jnp.sum(valid)


if __name__ == "__main__":
    key = jax.random.PRNGKey(0)
    k1, k2, k3, k4, k5, k6 = jax.random.split(key, 6)

    # config 1: clean shapes (HW multiple of 128, single pixel block)
    N, C, H, W = 2, 8, 16, 16
    OLD_CL = 4
    x = jax.random.normal(k1, (N, C, H, W), dtype=jnp.float32)
    tgt = jax.random.randint(k2, (N, H, W), 0, C, dtype=jnp.int32)
    tgt = jnp.where(jax.random.bernoulli(k3, 0.1, (N, H, W)), 255, tgt)

    loss = jax.block_until_ready(unbiased_cross_entropy(x, tgt, old_cl=OLD_CL))
    ref = _reference(x, tgt, old_cl=OLD_CL)
    assert jnp.allclose(loss, ref, atol=1e-5, rtol=1e-5), (loss, ref)

    # config 2: ragged pixel tail + multi-step reduction axis + small C
    N2, C2, H2, W2 = 2, 6, 20, 20          # HW=400 -> 4 tiles of 128, tail=16
    OLD2 = 3
    x2 = jax.random.normal(k4, (N2, C2, H2, W2), dtype=jnp.float32)
    tgt2 = jax.random.randint(k5, (N2, H2, W2), 0, C2, dtype=jnp.int32)
    tgt2 = jnp.where(jax.random.bernoulli(k6, 0.1, (N2, H2, W2)), 255, tgt2)

    loss2 = jax.block_until_ready(
        unbiased_cross_entropy(x2, tgt2, old_cl=OLD2, block_pixels=128))
    ref2 = _reference(x2, tgt2, old_cl=OLD2)
    assert jnp.allclose(loss2, ref2, atol=1e-5, rtol=1e-5), (loss2, ref2)

    print("KERNEL_OK")
</pallas_src>

<mosaic_0001>
module attributes {stable_mosaic.version = 11 : i64} {
  func.func @_uce_kernel(%arg0: i32, %arg1: i32, %arg2: memref<1x8x256xf32, #tpu.memory_space<vmem>>, %arg3: memref<1x1x256xi32, #tpu.memory_space<vmem>>, %arg4: memref<1x1x1xf32, #tpu.memory_space<vmem>>, %arg5: memref<1x1x1xf32, #tpu.memory_space<vmem>>, %arg6: memref<1x256xf32, #tpu.memory_space<vmem>>, %arg7: memref<1x256xf32, #tpu.memory_space<vmem>>) attributes {dimension_semantics = [#tpu.dimension_semantics<parallel>, #tpu.dimension_semantics<arbitrary>], iteration_bounds = array<i64: 2, 1>, scalar_prefetch = 0 : i64, scratch_operands = 2 : i64, tpu.core_type = #tpu.core_type<tc>, window_params = [{transform_indices = @transform_0, window_bounds = array<i64: 1, 8, 256>}, {transform_indices = @transform_1, window_bounds = array<i64: 1, 1, 256>}, {transform_indices = @transform_2, window_bounds = array<i64: 1, 1, 1>}, {transform_indices = @transform_3, window_bounds = array<i64: 1, 1, 1>}]} {
    %c0_i32 = arith.constant 0 : i32
    %0 = arith.cmpi eq, %arg1, %c0_i32 : i32
    %1 = arith.extui %0 : i1 to i32
    %c0_i32_0 = arith.constant 0 : i32
    %2 = arith.cmpi ne, %1, %c0_i32_0 : i32
    scf.if %2 {
      %cst_26 = arith.constant 0.000000e+00 : f32
      %61 = vector.broadcast %cst_26 : f32 to vector<1x256xf32>
      %c0_27 = arith.constant 0 : index
      %c0_28 = arith.constant 0 : index
      %62 = vector.load %arg6[%c0_27, %c0_28] : memref<1x256xf32, #tpu.memory_space<vmem>>, vector<1x256xf32>
      tpu.vector_store %arg6[%c0_27, %c0_28], %61 {strides = array<i32>} : memref<1x256xf32, #tpu.memory_space<vmem>>, vector<1x256xf32>,
      %cst_29 = arith.constant 0.000000e+00 : f32
      %63 = vector.broadcast %cst_29 : f32 to vector<1x256xf32>
      %c0_30 = arith.constant 0 : index
      %c0_31 = arith.constant 0 : index
      %64 = vector.load %arg7[%c0_30, %c0_31] : memref<1x256xf32, #tpu.memory_space<vmem>>, vector<1x256xf32>
      tpu.vector_store %arg7[%c0_30, %c0_31], %63 {strides = array<i32>} : memref<1x256xf32, #tpu.memory_space<vmem>>, vector<1x256xf32>,
    } else {
    }
    %c0 = arith.constant 0 : index
    %c0_1 = arith.constant 0 : index
    %c0_2 = arith.constant 0 : index
    %3 = vector.load %arg2[%c0, %c0_1, %c0_2] : memref<1x8x256xf32, #tpu.memory_space<vmem>>, vector<1x8x256xf32>
    %4 = vector.shape_cast %3 : vector<1x8x256xf32> to vector<8x256xf32>
    %c0_3 = arith.constant 0 : index
    %c0_4 = arith.constant 0 : index
    %c0_5 = arith.constant 0 : index
    %5 = vector.load %arg3[%c0_3, %c0_4, %c0_5] : memref<1x1x256xi32, #tpu.memory_space<vmem>>, vector<1x1x256xi32>
    %6 = vector.shape_cast %5 : vector<1x1x256xi32> to vector<1x256xi32>
    %7 = tpu.iota {dimensions = array<i32: 0>} : vector<8x256xi32>
    %cst = arith.constant dense<0xFF800000> : vector<256xf32>
    %8 = vector.multi_reduction <maximumf>, %4, %cst [0] : vector<8x256xf32> to vector<256xf32>
    %9 = vector.shape_cast %8 : vector<256xf32> to vector<1x256xf32>
    %10 = vector.broadcast %9 : vector<1x256xf32> to vector<8x256xf32>
    %11 = arith.subf %4, %10 : vector<8x256xf32>
    %12 = math.exp %11 : vector<8x256xf32>
    %cst_6 = arith.constant dense<0.000000e+00> : vector<256xf32>
    %13 = vector.multi_reduction <add>, %12, %cst_6 [0] : vector<8x256xf32> to vector<256xf32>
    %14 = vector.shape_cast %13 : vector<256xf32> to vector<1x256xf32>
    %15 = math.log %14 : vector<1x256xf32>
    %16 = arith.addf %9, %15 : vector<1x256xf32>
    %c4_i32 = arith.constant 4 : i32
    %17 = vector.broadcast %c4_i32 : i32 to vector<8x256xi32>
    %18 = arith.cmpi slt, %7, %17 : vector<8x256xi32>
    %cst_7 = arith.constant 0.000000e+00 : f32
    %19 = vector.broadcast %cst_7 : f32 to vector<8x256xf32>
    %20 = arith.select %18, %12, %19 : vector<8x256xi1>, vector<8x256xf32>
    %cst_8 = arith.constant dense<0.000000e+00> : vector<256xf32>
    %21 = vector.multi_reduction <add>, %20, %cst_8 [0] : vector<8x256xf32> to vector<256xf32>
    %22 = vector.shape_cast %21 : vector<256xf32> to vector<1x256xf32>
    %cst_9 = arith.constant 1.17549435E-38 : f32
    %23 = vector.broadcast %cst_9 : f32 to vector<1x256xf32>
    %24 = arith.maximumf %22, %23 : vector<1x256xf32>
    %25 = math.log %24 : vector<1x256xf32>
    %26 = arith.addf %9, %25 : vector<1x256xf32>
    %27 = vector.broadcast %6 : vector<1x256xi32> to vector<8x256xi32>
    %28 = arith.cmpi eq, %7, %27 : vector<8x256xi32>
    %cst_10 = arith.constant 0.000000e+00 : f32
    %29 = vector.broadcast %cst_10 : f32 to vector<8x256xf32>
    %30 = arith.select %28, %4, %29 : vector<8x256xi1>, vector<8x256xf32>
    %cst_11 = arith.constant dense<0.000000e+00> : vector<256xf32>
    %31 = vector.multi_reduction <add>, %30, %cst_11 [0] : vector<8x256xf32> to vector<256xf32>
    %32 = vector.shape_cast %31 : vector<256xf32> to vector<1x256xf32>
    %c4_i32_12 = arith.constant 4 : i32
    %33 = vector.broadcast %c4_i32_12 : i32 to vector<1x256xi32>
    %34 = arith.cmpi slt, %6, %33 : vector<1x256xi32>
    %35 = arith.select %34, %26, %32 : vector<1x256xi1>, vector<1x256xf32>
    %36 = arith.subf %35, %16 : vector<1x256xf32>
    %c256_i32 = arith.constant 256 : i32
    %37 = arith.muli %arg1, %c256_i32 : i32
    %38 = tpu.iota {dimensions = array<i32: 1>} : vector<1x256xi32>
    %39 = vector.broadcast %37 : i32 to vector<1x256xi32>
    %40 = arith.addi %39, %38 : vector<1x256xi32>
    %c255_i32 = arith.constant 255 : i32
    %41 = vector.broadcast %c255_i32 : i32 to vector<1x256xi32>
    %42 = arith.cmpi ne, %6, %41 : vector<1x256xi32>
    %c256_i32_13 = arith.constant 256 : i32
    %43 = vector.broadcast %c256_i32_13 : i32 to vector<1x256xi32>
    %44 = arith.cmpi slt, %40, %43 : vector<1x256xi32>
    %45 = arith.andi %42, %44 : vector<1x256xi1>
    %c0_14 = arith.constant 0 : index
    %c0_15 = arith.constant 0 : index
    %46 = vector.load %arg6[%c0_14, %c0_15] : memref<1x256xf32, #tpu.memory_space<vmem>>, vector<1x256xf32>
    %cst_16 = arith.constant 0.000000e+00 : f32
    %47 = vector.broadcast %cst_16 : f32 to vector<1x256xf32>
    %48 = arith.subf %47, %36 : vector<1x256xf32>
    %cst_17 = arith.constant 0.000000e+00 : f32
    %49 = vector.broadcast %cst_17 : f32 to vector<1x256xf32>
    %50 = arith.select %45, %48, %49 : vector<1x256xi1>, vector<1x256xf32>
    %51 = arith.addf %46, %50 : vector<1x256xf32>
    %c0_18 = arith.constant 0 : index
    %c0_19 = arith.constant 0 : index
    %52 = vector.load %arg6[%c0_18, %c0_19] : memref<1x256xf32, #tpu.memory_space<vmem>>, vector<1x256xf32>
    tpu.vector_store %arg6[%c0_18, %c0_19], %51 {strides = array<i32>} : memref<1x256xf32, #tpu.memory_space<vmem>>, vector<1x256xf32>,
    %c0_20 = arith.constant 0 : index
    %c0_21 = arith.constant 0 : index
    %53 = vector.load %arg7[%c0_20, %c0_21] : memref<1x256xf32, #tpu.memory_space<vmem>>, vector<1x256xf32>
    %54 = arith.extui %45 : vector<1x256xi1> to vector<1x256xi32>
    %55 = arith.sitofp %54 : vector<1x256xi32> to vector<1x256xf32>
    %56 = arith.addf %53, %55 : vector<1x256xf32>
    %c0_22 = arith.constant 0 : index
    %c0_23 = arith.constant 0 : index
    %57 = vector.load %arg7[%c0_22, %c0_23] : memref<1x256xf32, #tpu.memory_space<vmem>>, vector<1x256xf32>
    tpu.vector_store %arg7[%c0_22, %c0_23], %56 {strides = array<i32>} : memref<1x256xf32, #tpu.memory_space<vmem>>, vector<1x256xf32>,
    %c0_i32_24 = arith.constant 0 : i32
    %58 = arith.cmpi eq, %arg1, %c0_i32_24 : i32
    %59 = arith.extui %58 : i1 to i32
    %c0_i32_25 = arith.constant 0 : i32
    %60 = arith.cmpi ne, %59, %c0_i32_25 : i32
    scf.if %60 {
      %c0_26 = arith.constant 0 : index
      %c0_27 = arith.constant 0 : index
      %61 = vector.load %arg6[%c0_26, %c0_27] : memref<1x256xf32, #tpu.memory_space<vmem>>, vector<1x256xf32>
      %62 = vector.shape_cast %61 : vector<1x256xf32> to vector<1x1x256xf32>
      %cst_28 = arith.constant dense<0.000000e+00> : vector<1xf32>
      %63 = vector.multi_reduction <add>, %62, %cst_28 [1, 2] : vector<1x1x256xf32> to vector<1xf32>
      %64 = vector.shape_cast %63 : vector<1xf32> to vector<1x1x1xf32>
      %65 = vector.extract %64[0, 0, 0] : f32 from vector<1x1x1xf32>
      %66 = vector.broadcast %65 : f32 to vector<1x1x1xf32>
      %c0_29 = arith.constant 0 : index
      %c0_30 = arith.constant 0 : index
      %c0_31 = arith.constant 0 : index
      %67 = vector.load %arg4[%c0_29, %c0_30, %c0_31] : memref<1x1x1xf32, #tpu.memory_space<vmem>>, vector<1x1x1xf32>
      tpu.vector_store %arg4[%c0_29, %c0_30, %c0_31], %66 {strides = array<i32>} : memref<1x1x1xf32, #tpu.memory_space<vmem>>, vector<1x1x1xf32>,
      %c0_32 = arith.constant 0 : index
      %c0_33 = arith.constant 0 : index
      %68 = vector.load %arg7[%c0_32, %c0_33] : memref<1x256xf32, #tpu.memory_space<vmem>>, vector<1x256xf32>
      %69 = vector.shape_cast %68 : vector<1x256xf32> to vector<1x1x256xf32>
      %cst_34 = arith.constant dense<0.000000e+00> : vector<1xf32>
      %70 = vector.multi_reduction <add>, %69, %cst_34 [1, 2] : vector<1x1x256xf32> to vector<1xf32>
      %71 = vector.shape_cast %70 : vector<1xf32> to vector<1x1x1xf32>
      %72 = vector.extract %71[0, 0, 0] : f32 from vector<1x1x1xf32>
      %73 = vector.broadcast %72 : f32 to vector<1x1x1xf32>
      %c0_35 = arith.constant 0 : index
      %c0_36 = arith.constant 0 : index
      %c0_37 = arith.constant 0 : index
      %74 = vector.load %arg5[%c0_35, %c0_36, %c0_37] : memref<1x1x1xf32, #tpu.memory_space<vmem>>, vector<1x1x1xf32>
      tpu.vector_store %arg5[%c0_35, %c0_36, %c0_37], %73 {strides = array<i32>} : memref<1x1x1xf32, #tpu.memory_space<vmem>>, vector<1x1x1xf32>,
    } else {
    }
    return
  }
  func.func @transform_0(%arg0: i32, %arg1: i32) -> (i32, i32, i32) {
    %c0_i32 = arith.constant 0 : i32
    %c0_i32_0 = arith.constant 0 : i32
    return %arg0, %c0_i32, %arg1 : i32, i32, i32
  }
  func.func @transform_1(%arg0: i32, %arg1: i32) -> (i32, i32, i32) {
    %c0_i32 = arith.constant 0 : i32
    %c0_i32_0 = arith.constant 0 : i32
    return %arg0, %c0_i32, %arg1 : i32, i32, i32
  }
  func.func @transform_2(%arg0: i32, %arg1: i32) -> (i32, i32, i32) {
    %c0_i32 = arith.constant 0 : i32
    %c0_i32_0 = arith.constant 0 : i32
    %c0_i32_1 = arith.constant 0 : i32
    return %arg0, %c0_i32, %c0_i32_0 : i32, i32, i32
  }
  func.func @transform_3(%arg0: i32, %arg1: i32) -> (i32, i32, i32) {
    %c0_i32 = arith.constant 0 : i32
    %c0_i32_0 = arith.constant 0 : i32
    %c0_i32_1 = arith.constant 0 : i32
    return %arg0, %c0_i32, %c0_i32_0 : i32, i32, i32
  }
}

</mosaic_0001>

<bundles_post_ra>
// kernel: tpu_custom_call.1
= control target key start
LH: loop header
LB: loop body
LE: loop exit
PB: predicated region body
PF: predicated region fallthrough
CT: control target
= control target key end

     0   :  { %9 = vsyncpa [#allocation5], 0  ;;  %s1093_s0 = inlined_call_operand.hbm [shape: f32[2,8,256], index: 0, kind: input, shape index: {}]   ;;  %s1094_s1 = inlined_call_operand.hbm [shape: s32[2,1,256], index: 1, kind: input, shape index: {}]   ;;  %s1095_s2 = inlined_call_operand.vmem [shape: f32[2,1,1], index: 2, kind: output, shape index: {0}]   ;;  %s1096_s3 = inlined_call_operand.vmem [shape: f32[2,1,1], index: 3, kind: output, shape index: {1}]  }
   0x1   :  { %11 = vsyncpa [#allocation5 + $0x1], 0 }
   0x2   :  { %12 = vsyncpa [#allocation7], 0 }
   0x3   :  { %14 = vsyncpa [#allocation7 + $0x1], 0  ;;  %s868_s12 = smov 0   ;;  %s870_s13 = smov 0  }
   0x4   :  { %s872_s14 = smov 0   ;;  %s874_s15 = smov 0  }
   0x5   :  { %s876_s16 = smov 0   ;;  %s878_s17 = smov 0  }
   0x6 LB: > { %s630_s18 = sadd.s32 4294967295, %s841_s17   ;;  %s32_s19 = sadd.s32 1, %s837_s16  ;;  %s841_s17 = sphi %s878_s17, %s20_s17   ;;  %s837_s16 = sphi %s876_s16, %s1114_s16   ;;  %s833_s15 = sphi %s874_s15, %s1113_s15   ;;  %s829_s14 = sphi %s872_s14, %s1112_s14   ;;  %s825_s13 = sphi %s870_s13, %s1111_s13   ;;  %s821_s12 = sphi %s868_s12, %s1110_s12  }
   0x7   : > { %p34_p0 = scmp.ge.s32.totalorder %s32_s19, 2  ;;  %s41_s20 = sadd.s32 1, %s829_s14 }
   0x8   : > { %p48_p1 = scmp.ne.s32.totalorder %s829_s14, %s825_s13  ;;  %p49_p2 = scmp.eq.s32.totalorder %s841_s17, 0 }
   0x9   : > { %s1116_s19 = smov (%p34_p0, %s32_s19), 0  ;;  %p54_p4 = scmp.ne.s32.totalorder %s825_s13, %s821_s12 }
   0xa   : > { %p904_p3 = por %p49_p2, %p48_p1  ;;  %s36_s22 = ssub.s32 %s837_s16, %s1116_s19 }
   0xb   : > { %p55_p5 = scmp.eq.s32.totalorder %s630_s18, 0  ;;  %p39_p6 = scmp.eq.s32.totalorder %s36_s22, 0 }
   0xc   : > { %p663_p8 = scmp.lt.s32.totalorder %s841_s17, 2  ;;  %s920_s25 = sand.u32 1, %s829_s14  }
   0xd   : > { %p911_p7 = por %p55_p5, %p54_p4  ;;  %s646_s26 = sshll.u32 %s837_s16, 8 }
   0xe   : > { %s917_s24 = scalar_select %p39_p6, %s829_s14, %s41_s20  }
   0xf   : > { %s1099_s23 = scalar_select %p911_p7, 1, 0 }
  0x10   : > { %s634_s27 = sshll.u32 %s920_s25, 4  ;;  %s927_s30 = scalar_lea.hbm %s1093_s0, %s646_s26 }
  0x11   : > { %s162_s4 = scalar_lea.vmem [#allocation4], %s634_s27  ;;  %p931_p9 = pnand %p663_p8, %p904_p3 }
  0x12   : > { %s172_s5 = sshll.u32 %s162_s4, 4  ;;  %s159_s7 = scalar_lea.sflag [#allocation5], %s920_s25  ;;  %s935_s5 = int_to_ptr.vmem [resolvable:$true] %s172_s5 }
  0x13   : > { %s727_s8 = scalar_lea.hbm %s927_s30, 256  ;;  %p729_p13 = pneg %p931_p9 }
  0x14   : > { %p728_p12 = scmp.ne.s32.totalorder %s927_s30, %s727_s8  ;;  %s732_s11 = scalar_lea.hbm %s1093_s0, 512 }
  0x15   : > { %p733_p2 = scmp.lt.u32.totalorder %s927_s30, %s1093_s0  ;;  %p734_p3 = scmp.lt.u32.totalorder %s732_s11, %s727_s8 }
  0x16   : > { %p730_p0 = pnand %p729_p13, %p728_p12  ;;  %p736_p5 = scmp.lt.u32.totalorder %s727_s8, %s927_s30 }
  0x17   : > { %p735_p4 = por %p734_p3, %p733_p2 }
  0x18   : > { %p731_p1 = pneg %p730_p0 }
  0x19   : > { %p737_p6 = por %p736_p5, %p735_p4 }
  0x1b   : > { %p738_p8 = pnand %p737_p6, %p731_p1 }
  0x1d   : > { %741 = shalt.err (!%p738_p8)
}
  0x1e   : > { %s742_s20 = scalar_lea.vmem %s935_s5, 256  ;;  %s843_s21 = smov [#allocation4]  }
  0x1f   : > { %p743_p12 = scmp.ne.s32.totalorder %s935_s5, %s742_s20  ;;  %s747_s22 = sshll.u32 %s843_s21, 4  ;;  %s748_s22 = int_to_ptr.vmem [resolvable:$false] %s747_s22 }
  0x20   : > { %s749_s26 = scalar_lea.vmem %s748_s22, 512  ;;  %p750_p11 = scmp.lt.s32.totalorder %s935_s5, %s748_s22 }
  0x21   : > { %p745_p0 = pnand %p743_p12, %p729_p13  ;;  %p751_p2 = scmp.lt.s32.totalorder %s749_s26, %s742_s20 }
  0x23   : > { %p746_p10 = pneg %p745_p0  ;;  %p752_p3 = por %p751_p2, %p750_p11 }
  0x25   : > { %p753_p4 = pnand %p752_p3, %p746_p10 }
  0x27   : > { %756 = shalt.err (!%p753_p4)
}
  0x28   : > { %659 = dma.hbm_to_vmem [thread:$0]  (!%p931_p9), %s927_s30, 256, %s935_s5, %s159_s7  }
  0x29   : > { %p1101_p1 = scmp.lt.s32.totalorder %s841_s17, 3  ;;  %p1102_p5 = scmp.ge.s32.totalorder %s841_s17, 1 }
  0x2a   : > { %s637_s28 = sshll.u32 %s920_s25, 1  ;;  %s647_s29 = sshll.u32 %s837_s16, 5 }
  0x2b   : > { %p969_p6 = pnand %p1102_p5, %p1101_p1  ;;  %s978_s9 = scalar_lea.hbm %s1094_s1, %s647_s29 }
  0x2c   : > { %s183_s10 = scalar_lea.vmem [#allocation6], %s637_s28  ;;  %s180_s30 = scalar_lea.sflag [#allocation7], %s920_s25 }
  0x2d   : > { %s1103_s27 = scalar_select %p969_p6, 1, 0 }
  0x2e   : > { %s193_s11 = sshll.u32 %s183_s10, 4  ;;  %s757_s5 = scalar_lea.hbm %s978_s9, 32  ;;  %s194_s11 = int_to_ptr.vmem [resolvable:$true] %s193_s11 }
  0x2f   : > { %p758_p10 = scmp.ne.s32.totalorder %s978_s9, %s757_s5  ;;  %s762_s18 = scalar_lea.hbm %s1094_s1, 64 }
  0x30   : > { %p763_p12 = scmp.lt.u32.totalorder %s978_s9, %s1094_s1  ;;  %p764_p0 = scmp.lt.u32.totalorder %s762_s18, %s757_s5 }
  0x31   : > { %p760_p11 = pnand %p758_p10, %p729_p13  ;;  %p766_p3 = scmp.lt.u32.totalorder %s757_s5, %s978_s9 }
  0x32   : > { %p765_p2 = por %p764_p0, %p763_p12 }
  0x33   : > { %p761_p8 = pneg %p760_p11 }
  0x34   : > { %p767_p4 = por %p766_p3, %p765_p2 }
  0x36   : > { %p768_p1 = pnand %p767_p4, %p761_p8 }
  0x38   : > { %771 = shalt.err (!%p768_p1)
}
  0x39   : > { %s772_s25 = scalar_lea.vmem %s194_s11, 32  ;;  %s844_s22 = smov [#allocation6]  }
  0x3a   : > { %p773_p5 = scmp.ne.s32.totalorder %s194_s11, %s772_s25  ;;  %s777_s26 = sshll.u32 %s844_s22, 4  ;;  %s778_s26 = int_to_ptr.vmem [resolvable:$false] %s777_s26 }
  0x3b   : > { %s779_s28 = scalar_lea.vmem %s778_s26, 64  ;;  %p780_p7 = scmp.lt.s32.totalorder %s194_s11, %s778_s26 }
  0x3c   : > { %p775_p10 = pnand %p773_p5, %p729_p13  ;;  %p781_p6 = scmp.lt.s32.totalorder %s779_s28, %s772_s25 }
  0x3e   : > { %p776_p11 = pneg %p775_p10  ;;  %p782_p0 = por %p781_p6, %p780_p7 }
  0x40   : > { %p783_p12 = pnand %p782_p0, %p776_p11 }
  0x42   : > { %786 = shalt.err (!%p783_p12)
}
  0x43   : > { %662 = dma.hbm_to_vmem [thread:$0]  (!%p931_p9), %s978_s9, 32, %s194_s11, %s180_s30  }
  0x44   : > { %p1104_p8 = scmp.ne.s32.totalorder %s1103_s27, 0 }
  0x45   : > { %s204_s29 = sand.u32 (!%p1104_p8), 1, %s825_s13   ;;  %p1105_p13 = scmp.ne.s32.totalorder (!%p1104_p8), %s1099_s23, 0 }
  0x46   : > { %202 = sbr.rel (%p1104_p8) target bundleno = 377 (0x179), region = 28  ;;  %s641_s4 = sshll.u32 (!%p1104_p8), %s204_s29, 4 }
  0x47   : > { %s205_s8 = scalar_lea.sflag (!%p1104_p8), [#allocation5], %s204_s29  ;;  %s208_s10 = scalar_lea.vmem (!%p1104_p8), [#allocation4], %s641_s4 }
  0x4d   : > { %812 = dma.done.wait (%p1105_p13), %s205_s8, 256  }
  0x4e   : > { %814 = vsyncadd (%p1105_p13), %s205_s8, 4294967040  ;;  %s642_s5 = sshll.u32 %s204_s29, 1  ;;  %s214_s7 = scalar_lea.sflag [#allocation7], %s204_s29 }
  0x4f   : > { %s217_s6 = scalar_lea.vmem [#allocation6], %s642_s5 }
  0x50   : > { %816 = dma.done.wait (%p1105_p13), %s214_s7, 32  }
  0x51   : > { %818 = vsyncadd (%p1105_p13), %s214_s7, 4294967264  ;;  %v258_v0 = vlaneseq  ;;  %v845_v1 = vmov 1966171168   ;;  %v846_v4 = vmov 0.0   ;;  %v847_v7 = vmov 1   ;;  %v264_v10 = vld [vmem:[%s208_s10] sm:$0xff] }
  0x52   : > { %v357_v2 = vunpack.c.l.s4 %v845_v1  ;;  %v421_v8 = vcombine.low %v847_v7, %v847_v7  ;;  %v265_v11 = vld [vmem:[%s208_s10 + $0x8] sm:$0xff]  ;;  %v1022_v13 = vld [vmem:[%s217_s6] sm:$0x3]  ;;  %v269_v14 = vrot.slane %v264_v10, 4  ;;  %vm467_vm8 = vcmask 1040384   ;;  %p248_p7 = scmp.lt.s32.totalorder %s833_s15, 1 }
  0x53   : > { %vm1011_vm0 = vcmp.lt.s32.totalorder %v258_v0, 256  ;;  %v268_v5 = vshrl.u32 %v258_v0, 7  ;;  %v275_v15 = vrot.slane %v265_v11, 4  ;;  %vm416_vm1 = vcmp.ne.s32.totalorder %v1022_v13, 255 }
  0x54   : > { %262 = vst.msk [vmem:[#allocation2] sm:$0x3] %vm1011_vm0, %v846_v4  ;;  %263 = vst.msk [vmem:[#allocation3] sm:$0x3] %vm1011_vm0, %v846_v4  ;;  %v358_v6 = vunpack.c.0.s8 %v357_v2  ;;  %v270_v17 = vmax.f32 %v264_v10, %v269_v14  ;;  %vm352_vm7 = vcmp.lt.s32.totalorder %v1022_v13, 4  ;;  %s1118_s15 = smov (!%p248_p7, %s833_s15), 1 }
  0x55   : > { %v276_v18 = vmax.f32 %v265_v11, %v275_v15  ;;  %v1040_v33 = vsub.s32 0, %v268_v5  ;;  %v1042_v36 = vsub.s32 1, %v268_v5  ;;  %vm305_vm6 = vcmp.lt.s32.totalorder %v268_v5, 4  ;;  %s250_s9 = scalar_lea.vmem %s1095_s2, %s1118_s15  ;;  %s253_s18 = scalar_lea.vmem %s1096_s3, %s1118_s15 }
  0x56   : > { %v1019_v9 = vsub.s32 %v358_v6, %v268_v5  ;;  %v271_v19 = vrot.slane %v270_v17, 2  ;;  %vm481_vm9 = vcmask 0  }
  0x57   : > { %v277_v20 = vrot.slane %v276_v18, 2  ;;  %v331_v37 = vrot.slane %v1022_v13, %v1040_v33  ;;  %v335_v38 = vrot.slane %v1022_v13, %v1042_v36 }
  0x58   : > { %v428_v12 = vrot.slane %v421_v8, %v1019_v9  ;;  %v272_v24 = vmax.f32 %v270_v17, %v271_v19 }
  0x59   : > { %v278_v25 = vmax.f32 %v276_v18, %v277_v20  ;;  %vm336_vm4 = vcmp.eq.s32.totalorder %v268_v5, %v331_v37  ;;  %vm337_vm5 = vcmp.eq.s32.totalorder %v268_v5, %v335_v38 }
  0x5a   : > { %v435_v16 = vrot.slane %v428_v12, %v1019_v9  ;;  %v273_v27 = vrot.slane %v272_v24, 1  ;;  %v338_v39 = vsel %vm336_vm4, %v264_v10, 0.0  ;;  %v339_v40 = vsel %vm337_vm5, %v265_v11, 0.0 }
  0x5b   : > { %v447_v22 = vld [vmem:[#allocation3] sm:$0x3]  ;;  %v279_v28 = vrot.slane %v278_v25, 1  ;;  %v340_v45 = vrot.slane %v338_v39, 4  ;;  %v346_v49 = vrot.slane %v339_v40, 4 }
  0x5c   : > { %vm436_vm2 = vcmp.ne.s32.totalorder %v435_v16, 0  ;;  %v1034_v29 = vmax.f32 %v272_v24, %v273_v27 }
  0x5d   : > { %vm1026_vm3 = vmand %vm416_vm1, %vm436_vm2  ;;  %v1036_v30 = vmax.f32 %v278_v25, %v279_v28  ;;  %v341_v58 = vadd.f32 %v340_v45, %v338_v39  ;;  %v347_v59 = vadd.f32 %v346_v49, %v339_v40  ;;  %v438_v49 = vld [vmem:[#allocation2] sm:$0x3] }
  0x5e   : > { %v643_v23 = vsel %vm1026_vm3, 1.0, %v846_v4  ;;  %v281_v31 = vsub.f32 %v264_v10, %v1034_v29 }
  0x5f   : > { %v450_v26 = vadd.f32 %v643_v23, %v447_v22  ;;  %v282_v32 = vsub.f32 %v265_v11, %v1036_v30  ;;  %v342_v5 = vrot.slane %v341_v58, 2  ;;  %v348_v6 = vrot.slane %v347_v59, 2 }
  0x60   : > { %v283_v34 = vmul.f32 1.442695, %v281_v31 }
  0x61   : > { %451 = vst.msk [vmem:[#allocation3] sm:$0x3] %vm1011_vm0, %v450_v26  ;;  %v285_v35 = vmul.f32 1.442695, %v282_v32  ;;  %v343_v15 = vadd.f32 %v342_v5, %v341_v58  ;;  %v349_v16 = vadd.f32 %v348_v6, %v347_v59 }
  0x62   : > { %715 = vpow2.f32 %v283_v34 }
  0x63   : > { %717 = vpow2.f32 %v285_v35  ;;  %v344_v18 = vrot.slane %v343_v15, 1  ;;  %v350_v19 = vrot.slane %v349_v16, 1 }
  0x65   : > { %v345_v20 = vadd.f32 %v344_v18, %v343_v15  ;;  %v351_v22 = vadd.f32 %v350_v19, %v349_v16 }
  0x67   : > { %v373_v31 = vcombine.low %v345_v20, %v351_v22 }
  0x6c   : > { %v716_v41 = vpop.eup %715 }
  0x6d   : > { %v718_v42 = vpop.eup %717  ;;  %v287_v43 = vrot.slane %v716_v41, 4  ;;  %v306_v44 = vsel %vm305_vm6, %v716_v41, 0.0 }
  0x6e   : > { %v293_v46 = vrot.slane %v718_v42, 4  ;;  %v307_v47 = vsel %vm305_vm6, %v718_v42, 0.0  ;;  %v308_v48 = vrot.slane %v306_v44, 4 }
  0x6f   : > { %v288_v50 = vadd.f32 %v716_v41, %v287_v43  ;;  %v314_v51 = vrot.slane %v307_v47, 4  ;;  %v380_v41 = vrot.slane %v373_v31, %v1019_v9 }
  0x70   : > { %v294_v52 = vadd.f32 %v718_v42, %v293_v46  ;;  %v309_v53 = vadd.f32 %v308_v48, %v306_v44 }
  0x71   : > { %v289_v54 = vrot.slane %v288_v50, 2  ;;  %v315_v55 = vadd.f32 %v314_v51, %v307_v47  ;;  %v387_v45 = vrot.slane %v380_v41, %v1019_v9 }
  0x72   : > { %v295_v56 = vrot.slane %v294_v52, 2  ;;  %v310_v57 = vrot.slane %v309_v53, 2 }
  0x73   : > { %v290_v60 = vadd.f32 %v289_v54, %v288_v50  ;;  %v316_v61 = vrot.slane %v315_v55, 2 }
  0x74   : > { %v296_v62 = vadd.f32 %v295_v56, %v294_v52  ;;  %v311_v63 = vadd.f32 %v310_v57, %v309_v53  ;;  %v483_v52 = vld [vmem:[#allocation3] sm:$0x3] }
  0x75   : > { %v291_v0 = vrot.slane %v290_v60, 1  ;;  %v317_v1 = vadd.f32 %v316_v61, %v315_v55  ;;  %v488_v53 = vrot.slane %v483_v52, %v1040_v33  ;;  %v492_v13 = vrot.slane %v483_v52, %v1042_v36 }
  0x76   : > { %v297_v2 = vrot.slane %v296_v62, 1  ;;  %v312_v4 = vrot.slane %v311_v63, 1 }
  0x77   : > { %v292_v7 = vadd.f32 %v291_v0, %v290_v60  ;;  %v318_v8 = vrot.slane %v317_v1, 1  ;;  %v495_v58 = vsel %vm467_vm8, %v488_v53, 0.0  ;;  %v496_v21 = vsel %vm467_vm8, %v492_v13, 0.0 }
  0x78   : > { %v298_v10 = vadd.f32 %v297_v2, %v296_v62  ;;  %v313_v11 = vadd.f32 %v312_v4, %v311_v63  ;;  %v497_v60 = vadd.f32 %v496_v21, %v495_v58 }
  0x79   : > { %719 = vlog2.f32 %v292_v7  ;;  %v319_v12 = vadd.f32 %v318_v8, %v317_v1 }
  0x7a   : > { %721 = vlog2.f32 %v298_v10  ;;  %v320_v14 = vmax.f32 %v313_v11, 1.1754944e-38 }
  0x7b   : > { %v321_v17 = vmax.f32 %v319_v12, 1.1754944e-38 }
  0x7c   : > { %723 = vlog2.f32 %v320_v14 }
  0x7d   : > { %725 = vlog2.f32 %v321_v17 }
  0x83   : > { %v720_v23 = vpop.eup %719 }
  0x84   : > { %v722_v24 = vpop.eup %721  ;;  %v300_v25 = vmul.f32 0.6931472, %v720_v23 }
  0x85   : > { %v302_v26 = vmul.f32 0.6931472, %v722_v24 }
  0x86   : > { %v724_v27 = vpop.eup %723  ;;  %v303_v28 = vadd.f32 %v300_v25, %v1034_v29 }
  0x87   : > { %v726_v32 = vpop.eup %725  ;;  %v304_v34 = vadd.f32 %v302_v26, %v1036_v30  ;;  %v323_v35 = vmul.f32 0.6931472, %v724_v27 }
  0x88   : > { %v325_v37 = vmul.f32 0.6931472, %v726_v32 }
  0x89   : > { %v326_v38 = vadd.f32 %v323_v35, %v1034_v29  ;;  %v392_v39 = vcombine.low %v303_v28, %v304_v34 }
  0x8a   : > { %v327_v40 = vadd.f32 %v325_v37, %v1036_v30 }
  0x8b   : > { %v399_v42 = vrot.slane %v392_v39, %v1019_v9 }
  0x8c   : > { %v355_v43 = vcombine.low %v326_v38, %v327_v40 }
  0x8d   : > { %v406_v46 = vrot.slane %v399_v42, %v1019_v9 }
  0x8e   : > { %v362_v44 = vrot.slane %v355_v43, %v1019_v9 }
  0x90   : > { %v369_v47 = vrot.slane %v362_v44, %v1019_v9 }
  0x92   : > { %v389_v48 = vsel %vm352_vm7, %v369_v47, %v387_v45 }
  0x93   : > { %v408_v29 = vsub.f32 %v389_v48, %v406_v46 }
  0x95   : > { %v439_v50 = vsub.f32 0.0, %v408_v29 }
  0x97   : > { %v440_v30 = vsel %vm1026_vm3, %v439_v50, 0.0 }
  0x98   : > { %v441_v51 = vadd.f32 %v440_v30, %v438_v49 }
  0x9a   : > { %446 = vst.msk [vmem:[#allocation2] sm:$0x3] %vm1011_vm0, %v441_v51 }
  0xa1   : > { %v455_v54 = vld [vmem:[#allocation2] sm:$0x3] }
  0xa2   : > { %v460_v9 = vrot.slane %v455_v54, %v1040_v33  ;;  %v464_v55 = vrot.slane %v455_v54, %v1042_v36 }
  0xa4   : > { %v468_v56 = vsel %vm467_vm8, %v460_v9, 0.0  ;;  %v469_v57 = vsel %vm467_vm8, %v464_v55, 0.0 }
  0xa5   : > { %v470_v59 = vadd.f32 %v469_v57, %v468_v56 }
  0xa7   : > { %471 = vadd.xlane.f32.xlu0 %v470_v59 }
  0xab   : > { %498 = vadd.xlane.f32.xlu0 %v497_v60 }
 0x134   : > { %v472_v3 = vpop.xlane.xlu0 %471 }
 0x135   : > { %v473_v61 = vrot.slane %v472_v3, 4 }
 0x137   : > { %v474_v62 = vadd.f32 %v473_v61, %v472_v3 }
 0x138   : > { %v499_v63 = vpop.xlane.xlu0 %498 }
 0x139   : > { %v475_v0 = vrot.slane %v474_v62, 2  ;;  %v500_v1 = vrot.slane %v499_v63, 4 }
 0x13b   : > { %v501_v2 = vadd.f32 %v500_v1, %v499_v63  ;;  %v476_v33 = vadd.f32 %v475_v0, %v474_v62 }
 0x13d   : > { %v502_v4 = vrot.slane %v501_v2, 2  ;;  %v477_v36 = vrot.slane %v476_v33, 1 }
 0x13f   : > { %v503_v5 = vadd.f32 %v502_v4, %v501_v2  ;;  %v478_v6 = vadd.f32 %v477_v36, %v476_v33 }
 0x141   : > { %648 = vpush %v478_v6  ;;  %v504_v7 = vrot.slane %v503_v5, 1 }
 0x143   : > { %v505_v8 = vadd.f32 %v504_v7, %v503_v5 }
 0x145   : > { %650 = vpush %v505_v8 }
 0x172   : > { %s649_s11 = spop %648 }
 0x173   : > { %v480_v10 = vstv %s649_s11 }
 0x174   : > { %482 = vst.msk [vmem:[%s250_s9] sm:$0x1] %vm481_vm9, %v480_v10 }
 0x176   : > { %s651_s20 = spop %650 }
 0x177   : > { %v507_v11 = vstv %s651_s20 }
 0x178   : > { %508 = vst.msk [vmem:[%s253_s18] sm:$0x1] %vm481_vm9, %v507_v11 }
 0x179 PF: > { %s20_s17 = sadd.s32 1, %s841_s17   ;;  %s1110_s12 = smov %s825_s13 }
 0x17a   : > { %p17_p9 = scmp.ge.s32.totalorder %s20_s17, 4   ;;  %s1111_s13 = smov %s829_s14 }
 0x17b   : > { %s1112_s14 = smov %s917_s24  ;;  %s1113_s15 = smov %s837_s16 }
 0x17c   : > { %s1114_s16 = smov %s1116_s19  ;;  %19 = sbr.rel (!%p17_p9) target bundleno = 6 (0x6), region = 101 }
 0x183   :  { %538 = vsyncpa [#allocation5], 1 }
 0x184   :  { %540 = vsyncpa [#allocation5 + $0x1], 1 }
 0x185   :  { %541 = vsyncpa [#allocation7], 1 }
 0x186   :  { %543 = vsyncpa [#allocation7 + $0x1], 1 }

</bundles_post_ra>
